<compile_context>
chip_gen: v5e
topology: v5e:2x2
jax: 0.10.0
libtpu: 0.0.40
codegen_flags: <defaults>
</compile_context>

<pallas_src>
import functools
import math

import jax
import jax.numpy as jnp
import numpy as np
from jax.experimental import pallas as pl
from jax.experimental.pallas import tpu as pltpu

# ---- module constants ------------------------------------------------------
# Scaled down from the original (N1=N2=320, Nc=16, reso=4) so the example runs
# at small shapes; the weight / sigma formulas are preserved exactly.
N1 = 64
N2 = 64
Nc = 4
factor = 8
reso = 1
snr = 3
sigma = 0.12 * math.sqrt(8) / snr


def make_weight(n1: int, n2: int, reso: int, factor: int) -> jnp.ndarray:
    """torch: weight=0; weight[16r:n1-16r, 16r:n2-16r] = 1/(f * n1/(n1-32r) * n2/(n2-32r))"""
    val = 1.0 / (factor * n1 / (n1 - 32 * reso) * n2 / (n2 - 32 * reso))
    w = jnp.zeros((n1, n2), dtype=jnp.float32)
    w = w.at[16 * reso : n1 - 16 * reso, 16 * reso : n2 - 16 * reso].set(val)
    return w


# ---- helpers ---------------------------------------------------------------
def _row_support(weight, n1: int, align: int = 8):
    """[r0, r1) rows where weight has any nonzero entry, rounded out to `align`."""
    try:
        w = np.asarray(weight)
    except Exception:          # traced weight -> fall back to the full range
        return 0, n1
    rows = np.nonzero(np.any(w > 0, axis=1))[0]
    if rows.size == 0:
        return 0, 0
    r0 = (int(rows[0]) // align) * align
    r1 = min(n1, ((int(rows[-1]) + align) // align) * align)
    return r0, r1


def _pick_blocking(total: int, n1: int, band: int, lanes: int):
    """Choose (blk, grid, total_pad, vmem_limit) from the chip's VMEM capacity."""
    per_slice = (2 * n1 + band) * lanes * 4            # kspace-in + out + noise
    try:
        info = pltpu.get_tpu_info()
        vmem_cap = int(getattr(info, "vmem_capacity_bytes", 64 * 1024 * 1024))
    except Exception:
        vmem_cap = 64 * 1024 * 1024                    # conservative (v7x-sized)
    budget = min(int(vmem_cap * 0.40), 64 * 1024 * 1024)
    cap = max(1, budget // (2 * per_slice))            # x2: double-buffered
    cap = min(cap, max(1, total))

    # Prefer a divisor of `total` that gives an even grid (no padding) when it
    # does not shrink the block by more than ~2x; otherwise pad `total` up.
    best = 0
    for d in range(1, cap + 1):
        if total % d == 0 and (total // d) % 2 == 0:
            best = d
    if best > 0 and best * 2 >= cap:
        blk, grid, total_pad = best, total // best, total
    else:
        grid = max(2, pl.cdiv(total, cap))
        if grid % 2:
            grid += 1
        blk = pl.cdiv(total, grid)
        grid = pl.cdiv(total, blk)
        if grid % 2:
            grid += 1
        total_pad = grid * blk

    vmem_limit = int(min(vmem_cap * 3 // 4, 96 * 1024 * 1024))
    return blk, grid, total_pad, vmem_limit


# ---- Pallas kernel ---------------------------------------------------------
def _sample_uni_kernel(sm_ref, k_ref, n_ref, o_ref, *, blk, r0, r1, n1, lanes):
    # sm_ref : (band, lanes)      sigma*sqrt(weight) for the nonzero row band
    # k_ref  : (blk, n1, lanes)   blk (batch, coil) slices of kspace
    # n_ref  : (blk, band, lanes) standard-normal noise for the band rows only
    # o_ref  : (blk, n1, lanes)
    sm = sm_ref[...][None, :, :]                       # resident mask
    kb = k_ref[:, r0:r1, :]
    band_out = jnp.where(sm > 0.0, kb, 0.0) + n_ref[...] * sm
    o_ref[:, r0:r1, :] = band_out.astype(o_ref.dtype)
    # Zero-weight rows: mask == 0 so the forward is exactly zero there;
    # write zeros without any noise read or mask math.
    if r0 > 0:
        o_ref[:, :r0, :] = jnp.zeros((blk, r0, lanes), o_ref.dtype)
    if r1 < n1:
        o_ref[:, r1:, :] = jnp.zeros((blk, n1 - r1, lanes), o_ref.dtype)


# ---- wrapper ---------------------------------------------------------------
def sample_uni(kspace: jnp.ndarray, weight: jnp.ndarray, sigma: float,
               noise_key) -> jnp.ndarray:
    """kspace: (B, Nc, N1, N2, 2) float32.  weight: (N1, N2).  noise_key: PRNG key."""
    B, C, n1, n2, two = kspace.shape
    assert two == 2
    assert (2 * n2) % 128 == 0 and n1 % 8 == 0, "shape must be (8,128)-aligned"
    # sigma is folded into the mask, so (sm > 0) == (weight > 0) requires sigma > 0
    assert sigma > 0.0

    lanes = 2 * n2
    total = B * C

    r0, r1 = _row_support(weight, n1)
    if r1 <= r0:                                       # mask identically zero
        return jnp.zeros_like(kspace)
    band = r1 - r0

    # sigma*sqrt(weight) for the band rows, repeated x2 along the last axis to
    # match the (n2, complex) lane interleaving of the reshape below.
    # TODO(synk): if called repeatedly with the same weight/sigma, hoist `sm`
    # out of the call to avoid rebuilding it per invocation.
    sm = jnp.repeat(sigma * jnp.sqrt(weight[r0:r1]), 2, axis=1).astype(jnp.float32)

    # Fold (B, Nc) into one axis and (N2, 2) into one lane-dense axis.
    k_f = kspace.reshape(total, n1, lanes)
    # Standard-normal noise only where the mask can be nonzero.
    noise = jax.random.normal(noise_key, (total, band, lanes), dtype=jnp.float32)

    blk, grid, total_pad, vmem_limit = _pick_blocking(total, n1, band, lanes)
    if total_pad > total:
        k_f = jnp.pad(k_f, ((0, total_pad - total), (0, 0), (0, 0)))
        noise = jnp.pad(noise, ((0, total_pad - total), (0, 0), (0, 0)))

    band_elems = total_pad * band * lanes
    cost = pl.CostEstimate(
        flops=3 * band_elems,
        transcendentals=0,                             # noise drawn outside the kernel
        bytes_accessed=(2 * total_pad * n1 * lanes + band_elems + band * lanes) * 4,
    )

    kernel = functools.partial(_sample_uni_kernel, blk=blk, r0=r0, r1=r1,
                               n1=n1, lanes=lanes)
    out = pl.pallas_call(
        kernel,
        out_shape=jax.ShapeDtypeStruct((total_pad, n1, lanes), kspace.dtype),
        grid_spec=pltpu.PrefetchScalarGridSpec(
            num_scalar_prefetch=0,
            grid=(grid,),
            in_specs=[
                # mask: constant block index -> DMA'd once, stays resident
                pl.BlockSpec((band, lanes), lambda i: (0, 0)),
                pl.BlockSpec((blk, n1, lanes), lambda i: (i, 0, 0)),
                pl.BlockSpec((blk, band, lanes), lambda i: (i, 0, 0)),
            ],
            out_specs=pl.BlockSpec((blk, n1, lanes), lambda i: (i, 0, 0)),
        ),
        compiler_params=pltpu.CompilerParams(
            dimension_semantics=("parallel",),
            vmem_limit_bytes=vmem_limit,
        ),
        cost_estimate=cost,
    )(sm, k_f, noise)

    if total_pad > total:
        out = out[:total]
    return out.reshape(B, C, n1, n2, 2)


if __name__ == "__main__":
    key = jax.random.PRNGKey(0)
    kkey, nkey = jax.random.split(key)
    batch = 2
    kspace = jax.random.normal(kkey, (batch, Nc, N1, N2, 2), dtype=jnp.float32)
    weight = make_weight(N1, N2, reso, factor)

    out = jax.block_until_ready(sample_uni(kspace, weight, sigma, nkey))
    assert out.shape == kspace.shape and out.dtype == kspace.dtype

    # ---- exact reference check ---------------------------------------------
    # Rebuild the same deterministic noise and apply the PyTorch forward:
    #   (mask > 0) * kspace + sigma * randn * mask
    r0, r1 = _row_support(weight, N1)
    band = r1 - r0
    noise_band = np.asarray(
        jax.random.normal(nkey, (batch * Nc, band, 2 * N2), dtype=jnp.float32)
    ).reshape(batch, Nc, band, N2, 2)
    noise_full = np.zeros((batch, Nc, N1, N2, 2), np.float32)
    noise_full[:, :, r0:r1] = noise_band
    mask = np.sqrt(np.asarray(weight))[None, None, :, :, None]
    ref = (mask > 0).astype(np.float32) * np.asarray(kspace) + sigma * noise_full * mask
    np.testing.assert_allclose(np.asarray(out), ref, rtol=2e-5, atol=1e-6)

    # Outside the sampled region the forward is exactly zero.
    w_np = np.asarray(weight)
    keep = w_np > 0
    np.testing.assert_allclose(np.asarray(out)[:, :, ~keep, :], 0.0, atol=0.0)

    # Same key -> identical output (deterministic).
    out2 = jax.block_until_ready(sample_uni(kspace, weight, sigma, nkey))
    np.testing.assert_array_equal(np.asarray(out2), np.asarray(out))

    print("KERNEL_OK")
</pallas_src>

<mosaic_0001>
module attributes {stable_mosaic.version = 11 : i64} {
  func.func @_sample_uni_kernel(%arg0: i32, %arg1: memref<32x128xf32, #tpu.memory_space<vmem>>, %arg2: memref<4x64x128xf32, #tpu.memory_space<vmem>>, %arg3: memref<4x32x128xf32, #tpu.memory_space<vmem>>, %arg4: memref<4x64x128xf32, #tpu.memory_space<vmem>>) attributes {dimension_semantics = [#tpu.dimension_semantics<parallel>], iteration_bounds = array<i64: 2>, scalar_prefetch = 0 : i64, scratch_operands = 0 : i64, tpu.core_type = #tpu.core_type<tc>, window_params = [{pipeline_mode = #tpu.pipeline_mode<synchronous>, transform_indices = @transform_0, window_bounds = array<i64: 32, 128>}, {transform_indices = @transform_1, window_bounds = array<i64: 4, 64, 128>}, {transform_indices = @transform_2, window_bounds = array<i64: 4, 32, 128>}, {transform_indices = @transform_3, window_bounds = array<i64: 4, 64, 128>}]} {
    %c0 = arith.constant 0 : index
    %c0_0 = arith.constant 0 : index
    %0 = vector.load %arg1[%c0, %c0_0] : memref<32x128xf32, #tpu.memory_space<vmem>>, vector<32x128xf32>
    %1 = vector.shape_cast %0 : vector<32x128xf32> to vector<1x32x128xf32>
    %c0_1 = arith.constant 0 : index
    %c16 = arith.constant 16 : index
    %c0_2 = arith.constant 0 : index
    %2 = vector.load %arg2[%c0_1, %c16, %c0_2] : memref<4x64x128xf32, #tpu.memory_space<vmem>>, vector<4x32x128xf32>
    %cst = arith.constant 0.000000e+00 : f32
    %3 = vector.broadcast %cst : f32 to vector<1x32x128xf32>
    %4 = arith.cmpf ogt, %1, %3 : vector<1x32x128xf32>
    %cst_3 = arith.constant 0.000000e+00 : f32
    %5 = vector.shape_cast %4 : vector<1x32x128xi1> to vector<1x32x128xi1>
    %6 = vector.broadcast %5 : vector<1x32x128xi1> to vector<4x32x128xi1>
    %7 = vector.broadcast %cst_3 : f32 to vector<4x32x128xf32>
    %8 = arith.select %6, %2, %7 : vector<4x32x128xi1>, vector<4x32x128xf32>
    %c0_4 = arith.constant 0 : index
    %c0_5 = arith.constant 0 : index
    %c0_6 = arith.constant 0 : index
    %9 = vector.load %arg3[%c0_4, %c0_5, %c0_6] : memref<4x32x128xf32, #tpu.memory_space<vmem>>, vector<4x32x128xf32>
    %10 = vector.broadcast %1 : vector<1x32x128xf32> to vector<4x32x128xf32>
    %11 = arith.mulf %9, %10 : vector<4x32x128xf32>
    %12 = arith.addf %8, %11 : vector<4x32x128xf32>
    %c0_7 = arith.constant 0 : index
    %c16_8 = arith.constant 16 : index
    %c0_9 = arith.constant 0 : index
    %13 = vector.load %arg4[%c0_7, %c16_8, %c0_9] : memref<4x64x128xf32, #tpu.memory_space<vmem>>, vector<4x32x128xf32>
    tpu.vector_store %arg4[%c0_7, %c16_8, %c0_9], %12 {strides = array<i32>} : memref<4x64x128xf32, #tpu.memory_space<vmem>>, vector<4x32x128xf32>,
    %cst_10 = arith.constant 0.000000e+00 : f32
    %14 = vector.broadcast %cst_10 : f32 to vector<4x16x128xf32>
    %c0_11 = arith.constant 0 : index
    %c0_12 = arith.constant 0 : index
    %c0_13 = arith.constant 0 : index
    %15 = vector.load %arg4[%c0_11, %c0_12, %c0_13] : memref<4x64x128xf32, #tpu.memory_space<vmem>>, vector<4x16x128xf32>
    tpu.vector_store %arg4[%c0_11, %c0_12, %c0_13], %14 {strides = array<i32>} : memref<4x64x128xf32, #tpu.memory_space<vmem>>, vector<4x16x128xf32>,
    %cst_14 = arith.constant 0.000000e+00 : f32
    %16 = vector.broadcast %cst_14 : f32 to vector<4x16x128xf32>
    %c0_15 = arith.constant 0 : index
    %c48 = arith.constant 48 : index
    %c0_16 = arith.constant 0 : index
    %17 = vector.load %arg4[%c0_15, %c48, %c0_16] : memref<4x64x128xf32, #tpu.memory_space<vmem>>, vector<4x16x128xf32>
    tpu.vector_store %arg4[%c0_15, %c48, %c0_16], %16 {strides = array<i32>} : memref<4x64x128xf32, #tpu.memory_space<vmem>>, vector<4x16x128xf32>,
    return
  }
  func.func @transform_0(%arg0: i32) -> (i32, i32) {
    %c0_i32 = arith.constant 0 : i32
    %c0_i32_0 = arith.constant 0 : i32
    %c0_i32_1 = arith.constant 0 : i32
    return %c0_i32, %c0_i32_0 : i32, i32
  }
  func.func @transform_1(%arg0: i32) -> (i32, i32, i32) {
    %c0_i32 = arith.constant 0 : i32
    %c0_i32_0 = arith.constant 0 : i32
    %c0_i32_1 = arith.constant 0 : i32
    return %arg0, %c0_i32, %c0_i32_0 : i32, i32, i32
  }
  func.func @transform_2(%arg0: i32) -> (i32, i32, i32) {
    %c0_i32 = arith.constant 0 : i32
    %c0_i32_0 = arith.constant 0 : i32
    %c0_i32_1 = arith.constant 0 : i32
    return %arg0, %c0_i32, %c0_i32_0 : i32, i32, i32
  }
  func.func @transform_3(%arg0: i32) -> (i32, i32, i32) {
    %c0_i32 = arith.constant 0 : i32
    %c0_i32_0 = arith.constant 0 : i32
    %c0_i32_1 = arith.constant 0 : i32
    return %arg0, %c0_i32, %c0_i32_0 : i32, i32, i32
  }
}

</mosaic_0001>

<bundles_post_ra>
// kernel: tpu_custom_call.1
= control target key start
LH: loop header
LB: loop body
LE: loop exit
PB: predicated region body
PF: predicated region fallthrough
CT: control target
= control target key end

     0   :  { %8 = vsyncpa [#allocation3], 0  ;;  %s1117_s0 = inlined_call_operand.hbm [shape: f32[32,128], index: 0, kind: input, shape index: {}]   ;;  %s1118_s1 = inlined_call_operand.hbm [shape: f32[8,64,128], index: 1, kind: input, shape index: {}]   ;;  %s1119_s2 = inlined_call_operand.hbm [shape: f32[8,32,128], index: 2, kind: input, shape index: {}]   ;;  %s1120_s3 = inlined_call_operand.hbm [shape: f32[8,64,128], index: 3, kind: output, shape index: {}]  }
   0x1   :  { %9 = vsyncpa [#allocation6], 0 }
   0x2   :  { %11 = vsyncpa [#allocation6 + $0x1], 0 }
   0x3   :  { %12 = vsyncpa [#allocation4], 0 }
   0x4   :  { %14 = vsyncpa [#allocation4 + $0x1], 0  ;;  %s786_s12 = smov 0   ;;  %s788_s13 = smov 0  }
   0x5   :  { %s790_s14 = smov 0   ;;  %s792_s15 = smov 0  }
   0x6 LB: > { %s807_s16 = sadd.s32 1, %s758_s15   ;;  %s48_s17 = sadd.s32 1, %s754_s14  ;;  %s758_s15 = sphi %s792_s15, %s1134_s15   ;;  %s754_s14 = sphi %s790_s14, %s1133_s14   ;;  %s750_s13 = sphi %s788_s13, %s1132_s13   ;;  %s746_s12 = sphi %s786_s12, %s1131_s12  }
   0x7   : > { %s45_s18 = ssub.s32 %s758_s15, %s807_s16  ;;  %p55_p0 = scmp.ne.s32.totalorder %s754_s14, %s750_s13 }
   0x8   : > { %p46_p1 = scmp.eq.s32.totalorder %s45_s18, 0  ;;  %p56_p2 = scmp.eq.s32.totalorder %s758_s15, 0 }
   0x9   : > { %p557_p5 = scmp.lt.s32.totalorder %s758_s15, 2  ;;  %s151_s21 = sand.u32 1, %s758_s15  }
   0xa   : > { %s816_s19 = scalar_select %p46_p1, %s754_s14, %s48_s17  }
   0xb   : > { %p821_p3 = por %p56_p2, %p55_p0  ;;  %s153_s22 = sand.u32 1, %s754_s14  }
   0xc   : > { %s506_s23 = sshll.u32 %s153_s22, 8  ;;  %s526_s24 = sshll.u32 %s758_s15, 8 }
   0xd   : > { %s161_s27 = scalar_lea.hbm %s1118_s1, %s526_s24  ;;  %s155_s29 = scalar_lea.vmem [#allocation5], %s506_s23 }
   0xe   : > { %s162_s28 = sshll.u32 %s161_s27, 4  ;;  %s164_s30 = sshll.u32 %s155_s29, 4  ;;  %s163_s28 = int_to_ptr.hbm [resolvable:$true] %s162_s28  ;;  %s165_s30 = int_to_ptr.vmem [resolvable:$true] %s164_s30 }
   0xf   : > { %p835_p6 = pnand %p557_p5, %p821_p3  ;;  %s510_s5 = sshll.u32 %s153_s22, 7 }
  0x10   : > { %s178_s6 = scalar_lea.vmem [#allocation7], %s510_s5  ;;  %s841_s8 = scalar_lea.sflag [#allocation6], %s151_s21 }
  0x11   : > { %s839_s7 = sshll.u32 %s178_s6, 4  ;;  %s598_s9 = sshra.s32 %s163_s28, 4  ;;  %s599_s9 = int_to_ptr.hbm [resolvable:$true] %s598_s9  ;;  %s188_s7 = int_to_ptr.vmem [resolvable:$true] %s839_s7 }
  0x12   : > { %s600_s10 = scalar_lea.hbm %s599_s9, 256  ;;  %p602_p8 = pneg %p835_p6 }
  0x13   : > { %p601_p7 = scmp.ne.s32.totalorder %s599_s9, %s600_s10  ;;  %s605_s18 = scalar_lea.hbm %s1118_s1, 512 }
  0x14   : > { %p606_p11 = scmp.lt.s32.totalorder %s599_s9, %s1118_s1  ;;  %p607_p12 = scmp.lt.s32.totalorder %s605_s18, %s600_s10 }
  0x15   : > { %p603_p9 = pnand %p602_p8, %p601_p7 }
  0x16   : > { %p608_p13 = por %p607_p12, %p606_p11 }
  0x17   : > { %p604_p10 = pneg %p603_p9 }
  0x19   : > { %p609_p1 = pnand %p608_p13, %p604_p10 }
  0x1b   : > { %612 = shalt.err (!%p609_p1)
}
  0x1c   : > { %s760_s21 = smov 128   ;;  %s761_s23 = smov 8  }
  0x1d   : > { %548 = dma.hbm_to_vmem [thread:$0]  (!%p835_p6), %s163_s28, 4096, %s165_s30, %s841_s8, %s760_s21, %s760_s21, %s761_s23  }
  0x1e   : > { %s861_s24 = sadd.s32 4294967295, %s758_s15   ;;  %s502_s25 = sadd.s32 4294967294, %s758_s15  }
  0x1f   : > { %p61_p2 = scmp.ne.s32.totalorder %s750_s13, %s746_s12  ;;  %p1121_p3 = scmp.eq.s32.totalorder %s861_s24, 0 }
  0x20   : > { %p111_p5 = scmp.eq.s32.totalorder %s861_s24, 1  ;;  %p117_p7 = scmp.eq.s32.totalorder %s502_s25, 1 }
  0x21   : > { %p503_p9 = scmp.ge.s32.totalorder %s758_s15, 1  ;;  %p871_p10 = por %p1121_p3, %p61_p2 }
  0x22   : > { %p878_p11 = por %p111_p5, %p55_p0  ;;  %p882_p12 = por %p117_p7, %p61_p2 }
  0x23   : > { %p124_p13 = scmp.lt.s32.totalorder %s758_s15, 3  ;;  %s135_s5 = sshll.u32 %s1117_s0, 4  ;;  %s136_s5 = int_to_ptr.hbm [resolvable:$true] %s135_s5 }
  0x24   : > { %s528_s9 = sshll.u32 %s758_s15, 7  ;;  %s762_s10 = smov [#allocation2]  }
  0x25   : > { %p890_p1 = pnand %p503_p9, %p124_p13  ;;  %s137_s11 = sshll.u32 %s762_s10, 4  ;;  %s138_s11 = int_to_ptr.vmem [resolvable:$true] %s137_s11 }
  0x26   : > { %s184_s20 = scalar_lea.hbm %s1119_s2, %s528_s9  ;;  %s665_s9 = scalar_lea.hbm %s1119_s2, 256 }
  0x27   : > { %p541_p0 = pneg %p890_p1  ;;  %s185_s22 = sshll.u32 %s184_s20, 4  ;;  %s186_s22 = int_to_ptr.hbm [resolvable:$true] %s185_s22 }
  0x28   : > { %s658_s25 = sshra.s32 %s186_s22, 4  ;;  %s659_s25 = int_to_ptr.hbm [resolvable:$true] %s658_s25 }
  0x29   : > { %p542_p2 = pnand %p541_p0, %p1121_p3  ;;  %s660_s29 = scalar_lea.hbm %s659_s25, 128 }
  0x2a   : > { %p661_p5 = scmp.ne.s32.totalorder %s659_s25, %s660_s29  ;;  %p666_p13 = scmp.lt.s32.totalorder %s659_s25, %s1119_s2 }
  0x2b   : > { %544 = dma.hbm_to_vmem [thread:$0]  (!%p542_p2), %s136_s5, 512, %s138_s11, [#allocation3], %s760_s21, %s760_s21, %s761_s23  }
  0x2c   : > { %p663_p7 = pnand %p661_p5, %p602_p8  ;;  %p667_p0 = scmp.lt.s32.totalorder %s665_s9, %s660_s29 }
  0x2e   : > { %p664_p9 = pneg %p663_p7  ;;  %p668_p4 = por %p667_p0, %p666_p13 }
  0x30   : > { %p669_p3 = pnand %p668_p4, %p664_p9 }
  0x32   : > { %672 = shalt.err (!%p669_p3)
}
  0x33   : > { %551 = dma.hbm_to_vmem [thread:$0]  (!%p835_p6), %s186_s22, 2048, %s188_s7, %s841_s8, %s760_s21, %s760_s21, %s761_s23  }
  0x34   : > { %199 = sbr.rel (%p890_p1) target bundleno = 98 (0x62), region = 32  ;;  %p1128_p8 = scmp.eq.s32.totalorder (!%p890_p1), %s861_s24, 0 }
  0x39   : > { %733 = dma.done.wait (%p1128_p8), [#allocation3], 512   ;;  %p1129_p2 = pmov %p1128_p8 }
  0x3a   : > { %s206_s5 = sand.u32 1, %s861_s24   ;;  %s929_s11 = sand.u32 1, %s750_s13  }
  0x3b   : > { %735 = vsyncadd (%p1129_p2), [#allocation3], 4294966784  ;;  %s516_s4 = sshll.u32 %s929_s11, 8  ;;  %s207_s20 = scalar_lea.sflag [#allocation6], %s206_s5 }
  0x3c   : > { %s932_s25 = scalar_lea.vmem [#allocation5], %s516_s4 }
  0x3d   : > { %737 = dma.done.wait (%p871_p10), %s207_s20, 6144  }
  0x3e   : > { %739 = vsyncadd (%p871_p10), %s207_s20, 4294961152  ;;  %s517_s7 = sshll.u32 %s929_s11, 7  ;;  %s939_s8 = scalar_lea.vmem [#allocation8], %s516_s4  ;;  %v763_v0 = vmov 0.0   ;;  %v953_v1 = vld [vmem:[#allocation2] sm:$0xff]  ;;  %v256_v2 = vld [vmem:[%s932_s25 + $0x10] sm:$0xff] }
  0x3f   : > { %364 = vst [vmem:[%s939_s8] sm:$0xff] %v763_v0  ;;  %s956_s21 = scalar_lea.vmem [#allocation7], %s517_s7  ;;  %vm272_vm0 = vcmp.gt.f32.partialorder %v953_v1, 0.0  ;;  %v963_v5 = vld [vmem:[#allocation2 + $0x8] sm:$0xff]  ;;  %v257_v6 = vld [vmem:[%s932_s25 + $0x18] sm:$0xff]  ;;  %v973_v10 = vld [vmem:[#allocation2 + $0x10] sm:$0xff]  ;;  %s530_s23 = sshll.u32 %s861_s24, 8 }
  0x40   : > { %365 = vst [vmem:[%s939_s8 + $0x8] sm:$0xff] %v763_v0  ;;  %v300_v3 = vld [vmem:[%s956_s21] sm:$0xff]  ;;  %v301_v7 = vld [vmem:[%s956_s21 + $0x8] sm:$0xff]  ;;  %v284_v8 = vsel %vm272_vm0, %v256_v2, 0.0  ;;  %vm273_vm1 = vcmp.gt.f32.partialorder %v963_v5, 0.0  ;;  %v302_v12 = vld [vmem:[%s956_s21 + $0x10] sm:$0xff]  ;;  %s393_s22 = scalar_lea.hbm %s1120_s3, %s530_s23 }
  0x41   : > { %366 = vst [vmem:[%s939_s8 + $0x40] sm:$0xff] %v763_v0  ;;  %v316_v4 = vmul.f32 %v300_v3, %v953_v1  ;;  %v317_v9 = vmul.f32 %v301_v7, %v963_v5  ;;  %v258_v11 = vld [vmem:[%s932_s25 + $0x20] sm:$0xff]  ;;  %v285_v14 = vsel %vm273_vm1, %v257_v6, 0.0  ;;  %vm274_vm2 = vcmp.gt.f32.partialorder %v973_v10, 0.0  ;;  %v983_v16 = vld [vmem:[#allocation2 + $0x18] sm:$0xff]  ;;  %v259_v17 = vld [vmem:[%s932_s25 + $0x28] sm:$0xff] }
  0x42   : > { %367 = vst [vmem:[%s939_s8 + $0x48] sm:$0xff] %v763_v0  ;;  %v318_v15 = vmul.f32 %v302_v12, %v973_v10  ;;  %v303_v18 = vld [vmem:[%s956_s21 + $0x18] sm:$0xff]  ;;  %v286_v20 = vsel %vm274_vm2, %v258_v11, 0.0  ;;  %vm275_vm3 = vcmp.gt.f32.partialorder %v983_v16, 0.0  ;;  %v260_v22 = vld [vmem:[%s932_s25 + $0x50] sm:$0xff]  ;;  %v304_v23 = vld [vmem:[%s956_s21 + $0x20] sm:$0xff] }
  0x43   : > { %368 = vst [vmem:[%s939_s8 + $0x80] sm:$0xff] %v763_v0  ;;  %v332_v13 = vadd.f32 %v316_v4, %v284_v8  ;;  %v333_v19 = vadd.f32 %v317_v9, %v285_v14  ;;  %v319_v21 = vmul.f32 %v303_v18, %v983_v16  ;;  %v261_v24 = vld [vmem:[%s932_s25 + $0x58] sm:$0xff]  ;;  %v287_v26 = vsel %vm275_vm3, %v259_v17, 0.0  ;;  %v305_v29 = vld [vmem:[%s956_s21 + $0x28] sm:$0xff]  ;;  %v262_v30 = vld [vmem:[%s932_s25 + $0x60] sm:$0xff]  ;;  %s394_s29 = sshll.u32 %s939_s8, 4  ;;  %s395_s29 = int_to_ptr.vmem [resolvable:$true] %s394_s29 }
  0x44   : > { %369 = vst [vmem:[%s939_s8 + $0x88] sm:$0xff] %v763_v0  ;;  %v334_v25 = vadd.f32 %v318_v15, %v286_v20  ;;  %v288_v27 = vsel %vm272_vm0, %v260_v22, 0.0  ;;  %v320_v28 = vmul.f32 %v304_v23, %v953_v1  ;;  %v306_v31 = vld [vmem:[%s956_s21 + $0x30] sm:$0xff]  ;;  %v289_v33 = vsel %vm273_vm1, %v261_v24, 0.0  ;;  %v263_v36 = vld [vmem:[%s932_s25 + $0x68] sm:$0xff]  ;;  %v307_v37 = vld [vmem:[%s956_s21 + $0x38] sm:$0xff] }
  0x45   : > { %370 = vst [vmem:[%s939_s8 + $0xc0] sm:$0xff] %v763_v0  ;;  %v335_v32 = vadd.f32 %v319_v21, %v287_v26  ;;  %v321_v34 = vmul.f32 %v305_v29, %v963_v5  ;;  %v290_v35 = vsel %vm274_vm2, %v262_v30, 0.0  ;;  %v264_v38 = vld [vmem:[%s932_s25 + $0x90] sm:$0xff]  ;;  %v322_v40 = vmul.f32 %v306_v31, %v973_v10  ;;  %v308_v43 = vld [vmem:[%s956_s21 + $0x40] sm:$0xff]  ;;  %v265_v44 = vld [vmem:[%s932_s25 + $0x98] sm:$0xff]  ;;  %s396_s30 = sshll.u32 %s393_s22, 4  ;;  %s397_s30 = int_to_ptr.hbm [resolvable:$true] %s396_s30 }
  0x46   : > { %371 = vst [vmem:[%s939_s8 + $0xc8] sm:$0xff] %v763_v0  ;;  %v336_v39 = vadd.f32 %v320_v28, %v288_v27  ;;  %v291_v41 = vsel %vm275_vm3, %v263_v36, 0.0  ;;  %v323_v42 = vmul.f32 %v307_v37, %v983_v16  ;;  %v309_v45 = vld [vmem:[%s956_s21 + $0x48] sm:$0xff]  ;;  %v292_v47 = vsel %vm272_vm0, %v264_v38, 0.0  ;;  %v266_v50 = vld [vmem:[%s932_s25 + $0xa0] sm:$0xff]  ;;  %v310_v51 = vld [vmem:[%s956_s21 + $0x50] sm:$0xff] }
  0x47   : > { %372 = vst [vmem:[%s939_s8 + $0x30] sm:$0xff] %v763_v0  ;;  %v337_v46 = vadd.f32 %v321_v34, %v289_v33  ;;  %v324_v48 = vmul.f32 %v308_v43, %v953_v1  ;;  %v293_v49 = vsel %vm273_vm1, %v265_v44, 0.0  ;;  %v267_v52 = vld [vmem:[%s932_s25 + $0xa8] sm:$0xff]  ;;  %v338_v53 = vadd.f32 %v322_v40, %v290_v35  ;;  %v311_v57 = vld [vmem:[%s956_s21 + $0x58] sm:$0xff]  ;;  %v268_v58 = vld [vmem:[%s932_s25 + $0xd0] sm:$0xff]  ;;  %s381_s24 = scalar_lea.sflag [#allocation4], %s929_s11 }
  0x48   : > { %373 = vst [vmem:[%s939_s8 + $0x38] sm:$0xff] %v763_v0  ;;  %v339_v54 = vadd.f32 %v323_v42, %v291_v41  ;;  %v325_v55 = vmul.f32 %v309_v45, %v963_v5  ;;  %v294_v56 = vsel %vm274_vm2, %v266_v50, 0.0  ;;  %v312_v59 = vld [vmem:[%s956_s21 + $0x60] sm:$0xff]  ;;  %v326_v61 = vmul.f32 %v310_v51, %v973_v10  ;;  %v269_v2 = vld [vmem:[%s932_s25 + $0xd8] sm:$0xff]  ;;  %v313_v3 = vld [vmem:[%s956_s21 + $0x68] sm:$0xff]  ;;  %s702_s10 = sshra.s32 %s397_s30, 4  ;;  %s703_s10 = int_to_ptr.hbm [resolvable:$true] %s702_s10 }
  0x49   : > { %374 = vst [vmem:[%s939_s8 + $0x70] sm:$0xff] %v763_v0  ;;  %v340_v60 = vadd.f32 %v324_v48, %v292_v47  ;;  %v295_v62 = vsel %vm275_vm3, %v267_v52, 0.0  ;;  %v327_v63 = vmul.f32 %v311_v57, %v983_v16  ;;  %v270_v4 = vld [vmem:[%s932_s25 + $0xe0] sm:$0xff]  ;;  %v296_v7 = vsel %vm272_vm0, %v268_v58, 0.0  ;;  %v314_v11 = vld [vmem:[%s956_s21 + $0x70] sm:$0xff]  ;;  %v271_v12 = vld [vmem:[%s932_s25 + $0xe8] sm:$0xff]  ;;  %p709_p10 = scmp.lt.s32.totalorder %s703_s10, %s1120_s3 }
  0x4a   : > { %348 = vst [vmem:[%s939_s8 + $0x10] sm:$0xff] %v332_v13  ;;  %v341_v6 = vadd.f32 %v325_v55, %v293_v49  ;;  %v328_v8 = vmul.f32 %v312_v59, %v953_v1  ;;  %v297_v9 = vsel %vm273_vm1, %v269_v2, 0.0  ;;  %v315_v13 = vld [vmem:[%s956_s21 + $0x78] sm:$0xff]  ;;  %v342_v14 = vadd.f32 %v326_v61, %v294_v56  ;;  %s704_s9 = scalar_lea.hbm %s703_s10, 256  ;;  %s708_s5 = scalar_lea.hbm %s1120_s3, 512 }
  0x4b   : > { %349 = vst [vmem:[%s939_s8 + $0x18] sm:$0xff] %v333_v19  ;;  %v343_v15 = vadd.f32 %v327_v63, %v295_v62  ;;  %v329_v17 = vmul.f32 %v313_v3, %v963_v5  ;;  %v298_v18 = vsel %vm274_vm2, %v270_v4, 0.0  ;;  %v330_v19 = vmul.f32 %v314_v11, %v973_v10  ;;  %p705_p4 = scmp.ne.s32.totalorder %s703_s10, %s704_s9  ;;  %p710_p1 = scmp.lt.s32.totalorder %s708_s5, %s704_s9 }
  0x4c   : > { %350 = vst [vmem:[%s939_s8 + $0x20] sm:$0xff] %v334_v25  ;;  %v344_v1 = vadd.f32 %v328_v8, %v296_v7  ;;  %v299_v20 = vsel %vm275_vm3, %v271_v12, 0.0  ;;  %v331_v21 = vmul.f32 %v315_v13, %v983_v16 }
  0x4d   : > { %351 = vst [vmem:[%s939_s8 + $0x28] sm:$0xff] %v335_v32  ;;  %v345_v5 = vadd.f32 %v329_v17, %v297_v9  ;;  %v346_v22 = vadd.f32 %v330_v19, %v298_v18  ;;  %p706_p6 = pnand %p705_p4, %p878_p11  ;;  %p711_p5 = por %p710_p1, %p709_p10 }
  0x4e   : > { %352 = vst [vmem:[%s939_s8 + $0x50] sm:$0xff] %v336_v39  ;;  %v347_v23 = vadd.f32 %v331_v21, %v299_v20 }
  0x4f   : > { %353 = vst [vmem:[%s939_s8 + $0x58] sm:$0xff] %v337_v46  ;;  %p707_p3 = pneg %p706_p6 }
  0x50   : > { %354 = vst [vmem:[%s939_s8 + $0x60] sm:$0xff] %v338_v53 }
  0x51   : > { %355 = vst [vmem:[%s939_s8 + $0x68] sm:$0xff] %v339_v54  ;;  %p712_p7 = pnand %p711_p5, %p707_p3 }
  0x52   : > { %356 = vst [vmem:[%s939_s8 + $0x90] sm:$0xff] %v340_v60 }
  0x53   : > { %357 = vst [vmem:[%s939_s8 + $0x98] sm:$0xff] %v341_v6 }
  0x54   : > { %358 = vst [vmem:[%s939_s8 + $0xa0] sm:$0xff] %v342_v14 }
  0x55   : > { %359 = vst [vmem:[%s939_s8 + $0xa8] sm:$0xff] %v343_v15 }
  0x56   : > { %360 = vst [vmem:[%s939_s8 + $0xd0] sm:$0xff] %v344_v1 }
  0x57   : > { %361 = vst [vmem:[%s939_s8 + $0xd8] sm:$0xff] %v345_v5 }
  0x58   : > { %362 = vst [vmem:[%s939_s8 + $0xe0] sm:$0xff] %v346_v22 }
  0x59   : > { %363 = vst [vmem:[%s939_s8 + $0xe8] sm:$0xff] %v347_v23 }
  0x5a   : > { %375 = vst [vmem:[%s939_s8 + $0x78] sm:$0xff] %v763_v0 }
  0x5b   : > { %376 = vst [vmem:[%s939_s8 + $0xb0] sm:$0xff] %v763_v0 }
  0x5c   : > { %377 = vst [vmem:[%s939_s8 + $0xb8] sm:$0xff] %v763_v0 }
  0x5d   : > { %378 = vst [vmem:[%s939_s8 + $0xf0] sm:$0xff] %v763_v0 }
  0x5e   : > { %379 = vst [vmem:[%s939_s8 + $0xf8] sm:$0xff] %v763_v0 }
  0x5f   : > { %715 = shalt.err (!%p712_p7)
}
  0x60   : > { %s764_s11 = smov 128   ;;  %s765_s25 = smov 8  }
  0x61   : > { %539 = dma.vmem_to_hbm [thread:$0]  (%p878_p11), %s395_s29, 4096, %s397_s30, %s381_s24, %s764_s11, %s764_s11, %s765_s25  }
  0x62 PF: > { %s411_s7 = sand.u32 1, %s746_s12   ;;  %p1130_p9 = scmp.ge.s32.totalorder %s758_s15, 2 }
  0x63   : > { %s412_s8 = scalar_lea.sflag [#allocation4], %s411_s7 }
  0x64   : > { %p553_p13 = pnand %p1130_p9, %p882_p12 }
  0x66   : > { %p554_p0 = pneg %p553_p13 }
  0x68   : > { %741 = dma.done.wait (%p554_p0), %s412_s8, 4096  }
  0x69   : > { %743 = vsyncadd (%p554_p0), %s412_s8, 4294963200  ;;  %p17_p8 = scmp.ge.s32.totalorder %s807_s16, 4   ;;  %s1131_s12 = smov %s750_s13 }
  0x6a   : > { %s1132_s13 = smov %s754_s14  ;;  %s1133_s14 = smov %s816_s19 }
  0x6b   : > { %s1134_s15 = smov %s807_s16  ;;  %19 = sbr.rel (!%p17_p8) target bundleno = 6 (0x6), region = 93 }
  0x70   :  { %418 = vsyncpa [#allocation3], 1 }
  0x71   :  { %420 = vsyncpa [#allocation3 + $0x1], 1 }
  0x72   :  { %421 = vsyncpa [#allocation6], 1 }
  0x73   :  { %423 = vsyncpa [#allocation6 + $0x1], 1 }
  0x74   :  { %424 = vsyncpa [#allocation4], 1 }
  0x75   :  { %426 = vsyncpa [#allocation4 + $0x1], 1 }

</bundles_post_ra>
